<compile_context>
chip_gen: v5e
topology: v5e:2x2
jax: 0.10.0
libtpu: 0.0.40
codegen_flags: <defaults>
</compile_context>

<pallas_src>
import functools

import jax
import jax.numpy as jnp
from jax.experimental import pallas as pl
from jax.experimental.pallas import tpu as pltpu

LANE = 128
SUBLANE = 8


def _round_up(v, m):
    return ((v + m - 1) // m) * m


def _classifier_kernel(x_ref, wt_ref, o_ref):
    # bf16 cast happens on-chip (x stays f32 in HBM); MXU matmul accumulates in
    # f32; sigmoid epilogue runs in f32 on the VPU/EUP, all VMEM-resident.
    x = x_ref[...].astype(wt_ref.dtype)
    logits = jnp.dot(x, wt_ref[...], preferred_element_type=jnp.float32)
    o_ref[...] = jax.nn.sigmoid(logits).astype(o_ref.dtype)


def prepare_weight(weight, compute_dtype=jnp.bfloat16):
    """One-time (init-path) prep of the PyTorch-layout weight [num_classes, 128].

    Transposes to [128, num_classes] and casts to the compute dtype (bf16 by
    default: MXU-native on v6e/v7x and half the weight HBM traffic).  No class
    padding: the kernel emits the true num_classes width, so there is no
    post-kernel column slice.
    """
    return jnp.asarray(weight).T.astype(compute_dtype)


@functools.partial(jax.jit, static_argnames=("block_b", "block_n", "out_dtype"))
def classifier_forward(x, wt, *, block_b=1024, block_n=1024, out_dtype=jnp.float32):
    """x: [B, 128] (left in HBM as-is), wt: [128, num_classes] from prepare_weight().

    Returns sigmoid(x @ wt) with shape [B, num_classes] in out_dtype.
    """
    B, in_features = x.shape
    k, num_classes = wt.shape
    assert k == in_features, (k, in_features)

    # ---- tile selection ----------------------------------------------------
    # Class tile: one full-width tile when the vocab fits (full-dim last axis is
    # always a legal block); otherwise a lane-aligned tile (ragged last block is
    # masked by Pallas -> padded-garbage columns never reach HBM).
    if num_classes <= block_n:
        tn = num_classes
        n_tiled = False
    else:
        tn = max(LANE, (block_n // LANE) * LANE)
        n_tiled = True

    # Batch tile: sublane-aligned, capped at block_b; ragged last block handled
    # via pl.cdiv (no wrapper-side padding -> no extra HBM pass over x).
    tb = min(block_b, _round_up(B, SUBLANE))

    # Keep the double-buffered working set under ~12 MiB so it also fits v5e's
    # 16 MiB default scoped VMEM (v6e/v7x default is 32 MiB).
    x_bytes = x.dtype.itemsize
    w_bytes = wt.dtype.itemsize
    o_bytes = jnp.dtype(out_dtype).itemsize

    def step_bytes(tb_):
        return 2 * (tb_ * in_features * x_bytes
                    + in_features * tn * w_bytes
                    + tb_ * tn * o_bytes)

    budget = 12 * 1024 * 1024
    while tb > SUBLANE and step_bytes(tb) > budget:
        tb = _round_up(tb // 2, SUBLANE)

    nb = pl.cdiv(B, tb)

    if not n_tiled:
        grid = (nb,)
        in_specs = [
            pl.BlockSpec((tb, in_features), lambda i: (i, 0)),
            # Constant index map: the weight tile is DMA'd once and stays
            # VMEM-resident across all batch steps.
            pl.BlockSpec((in_features, tn), lambda i: (0, 0)),
        ]
        out_specs = pl.BlockSpec((tb, tn), lambda i: (i, 0))
        dims = ("parallel",)
    else:
        nn_ = pl.cdiv(num_classes, tn)
        # Class tiles outermost, batch innermost: each weight class-tile is
        # fetched once while the (smaller) x stream is the one re-read.
        grid = (nn_, nb)
        in_specs = [
            pl.BlockSpec((tb, in_features), lambda j, i: (i, 0)),
            pl.BlockSpec((in_features, tn), lambda j, i: (0, j)),
        ]
        out_specs = pl.BlockSpec((tb, tn), lambda j, i: (i, j))
        dims = ("parallel", "parallel")

    cost = pl.CostEstimate(
        flops=2 * B * in_features * num_classes,
        transcendentals=B * num_classes,  # exp in the sigmoid
        bytes_accessed=B * in_features * x_bytes
        + in_features * num_classes * w_bytes
        + B * num_classes * o_bytes,
    )

    return pl.pallas_call(
        _classifier_kernel,
        out_shape=jax.ShapeDtypeStruct((B, num_classes), out_dtype),
        grid_spec=pltpu.PrefetchScalarGridSpec(
            num_scalar_prefetch=0,
            grid=grid,
            in_specs=in_specs,
            out_specs=out_specs,
        ),
        compiler_params=pltpu.CompilerParams(
            dimension_semantics=dims,
            vmem_limit_bytes=32 * 1024 * 1024,
        ),
        cost_estimate=cost,
    )(x, wt)


def classifier(x, wt, *, block_b=1024, block_n=1024, out_dtype=jnp.float32,
               min_pallas_batch=64):
    """Dispatcher: tiny batches skip the Pallas launch entirely (a single-step
    pallas_call is dominated by fixed setup) and let XLA fuse matmul+sigmoid."""
    if x.shape[0] < min_pallas_batch:
        logits = jnp.dot(x.astype(wt.dtype), wt,
                         preferred_element_type=jnp.float32)
        return jax.nn.sigmoid(logits).astype(out_dtype)
    return classifier_forward(x, wt, block_b=block_b, block_n=block_n,
                              out_dtype=out_dtype)


if __name__ == "__main__":
    key = jax.random.PRNGKey(0)
    kx, kw = jax.random.split(key)

    in_features = 128      # fixed by nn.Linear(128, num_classes)
    num_classes = 16
    B = 300                # with block_b=128 -> grid of 3, ragged last block

    x = jax.random.normal(kx, (B, in_features), dtype=jnp.float32)
    # Deterministic init mimicking nn.Linear default (uniform in +/- 1/sqrt(fan_in)).
    bound = 1.0 / jnp.sqrt(jnp.float32(in_features))
    weight = jax.random.uniform(
        kw, (num_classes, in_features), dtype=jnp.float32, minval=-bound, maxval=bound
    )

    # Init-time prep (transpose + bf16 cast happen once, outside the hot path).
    wt = prepare_weight(weight)  # [128, 16] bf16

    # Pallas kernel path (multi-step grid with a ragged last batch block).
    out = classifier_forward(x, wt, block_b=128)
    out = jax.block_until_ready(out)

    # Reference in plain JAX f32 (module has bias=False, so no bias term).
    ref = jax.nn.sigmoid(x @ weight.T)
    assert out.shape == (B, num_classes)
    assert out.dtype == jnp.float32
    # bf16 inputs + f32 accumulation + f32 sigmoid -> loosen tolerance vs f32 ref.
    assert jnp.allclose(out, ref, atol=2e-2, rtol=2e-2), float(jnp.max(jnp.abs(out - ref)))

    # Tiny-batch path: dispatcher falls back to fused XLA (no Pallas launch overhead).
    small = classifier(x[:8], wt)
    small = jax.block_until_ready(small)
    assert jnp.allclose(small, ref[:8], atol=2e-2, rtol=2e-2)

    print("KERNEL_OK")
</pallas_src>

<mosaic_0001>
module attributes {stable_mosaic.version = 11 : i64} {
  func.func @_classifier_kernel(%arg0: i32, %arg1: memref<128x128xf32, #tpu.memory_space<vmem>>, %arg2: memref<128x16xbf16, #tpu.memory_space<vmem>>, %arg3: memref<128x16xf32, #tpu.memory_space<vmem>>) attributes {dimension_semantics = [#tpu.dimension_semantics<parallel>], iteration_bounds = array<i64: 3>, scalar_prefetch = 0 : i64, scratch_operands = 0 : i64, tpu.core_type = #tpu.core_type<tc>, window_params = [{transform_indices = @transform_0, window_bounds = array<i64: 128, 128>}, {pipeline_mode = #tpu.pipeline_mode<synchronous>, transform_indices = @transform_1, window_bounds = array<i64: 128, 16>}, {transform_indices = @transform_2, window_bounds = array<i64: 128, 16>}]} {
    %c0 = arith.constant 0 : index
    %c0_0 = arith.constant 0 : index
    %0 = vector.load %arg1[%c0, %c0_0] : memref<128x128xf32, #tpu.memory_space<vmem>>, vector<128x128xf32>
    %1 = arith.truncf %0 : vector<128x128xf32> to vector<128x128xbf16>
    %c0_1 = arith.constant 0 : index
    %c0_2 = arith.constant 0 : index
    %2 = vector.load %arg2[%c0_1, %c0_2] : memref<128x16xbf16, #tpu.memory_space<vmem>>, vector<128x16xbf16>
    %cst = arith.constant dense<0.000000e+00> : vector<128x16xf32>
    %3 = tpu.matmul %1, %2, %cst {dimension_numbers = #tpu.dot_dimension_numbers<[1], [0], [0], [1], [0, 0, 1, 1], [], []>} : vector<128x128xbf16>, vector<128x16xbf16>, vector<128x16xf32> -> vector<128x16xf32>
    %4 = arith.negf %3 : vector<128x16xf32>
    %5 = math.exp %4 : vector<128x16xf32>
    %cst_3 = arith.constant 1.000000e+00 : f32
    %6 = vector.broadcast %cst_3 : f32 to vector<128x16xf32>
    %7 = arith.addf %6, %5 : vector<128x16xf32>
    %8 = arith.divf %6, %7 : vector<128x16xf32>
    %c0_4 = arith.constant 0 : index
    %c0_5 = arith.constant 0 : index
    %9 = vector.load %arg3[%c0_4, %c0_5] : memref<128x16xf32, #tpu.memory_space<vmem>>, vector<128x16xf32>
    tpu.vector_store %arg3[%c0_4, %c0_5], %8 {strides = array<i32>} : memref<128x16xf32, #tpu.memory_space<vmem>>, vector<128x16xf32>,
    return
  }
  func.func @transform_0(%arg0: i32) -> (i32, i32) {
    %c0_i32 = arith.constant 0 : i32
    %c0_i32_0 = arith.constant 0 : i32
    return %arg0, %c0_i32 : i32, i32
  }
  func.func @transform_1(%arg0: i32) -> (i32, i32) {
    %c0_i32 = arith.constant 0 : i32
    %c0_i32_0 = arith.constant 0 : i32
    %c0_i32_1 = arith.constant 0 : i32
    return %c0_i32, %c0_i32_0 : i32, i32
  }
  func.func @transform_2(%arg0: i32) -> (i32, i32) {
    %c0_i32 = arith.constant 0 : i32
    %c0_i32_0 = arith.constant 0 : i32
    return %arg0, %c0_i32 : i32, i32
  }
}

</mosaic_0001>

<bundles_post_ra>
// kernel: classifier_forward.1
= control target key start
LH: loop header
LB: loop body
LE: loop exit
PB: predicated region body
PF: predicated region fallthrough
CT: control target
= control target key end

     0   :  { %7 = vsyncpa [#allocation3], 0  ;;  %s1814_s0 = inlined_call_operand.hbm [shape: f32[300,128], index: 0, kind: input, shape index: {}]   ;;  %s1815_s1 = inlined_call_operand.vmem [shape: bf16[128,16], index: 1, kind: input, shape index: {}]   ;;  %s1816_s2 = inlined_call_operand.vmem [shape: f32[300,16], index: 2, kind: output, shape index: {}]  }
   0x1   :  { %9 = vsyncpa [#allocation3 + $0x1], 0  ;;  %s1356_s9 = smov 0   ;;  %s1358_s10 = smov 0  }
   0x2   :  { %s1360_s11 = smov 0   ;;  %s1362_s12 = smov 0  }
   0x3 LB: > { %s1375_s13 = sadd.s32 4294967295, %s1304_s12   ;;  %s1378_s14 = sadd.s32 1, %s1304_s12   ;;  %s1304_s12 = sphi %s1362_s12, %s1848_s12   ;;  %s1300_s11 = sphi %s1360_s11, %s1847_s11   ;;  %s1296_s10 = sphi %s1358_s10, %s1846_s10   ;;  %s1292_s9 = sphi %s1356_s9, %s1845_s9  }
   0x4   : > { %s19_s15 = ssub.s32 %s1304_s12, %s1378_s14  ;;  %s22_s16 = sadd.s32 1, %s1300_s11 }
   0x5   : > { %p20_p0 = scmp.eq.s32.totalorder %s19_s15, 0  ;;  %p29_p1 = scmp.ne.s32.totalorder %s1300_s11, %s1296_s10 }
   0x6   : > { %p30_p2 = scmp.eq.s32.totalorder %s1304_s12, 0  ;;  %p35_p3 = scmp.ne.s32.totalorder %s1296_s10, %s1292_s9 }
   0x7   : > { %s1388_s17 = scalar_select %p20_p0, %s1300_s11, %s22_s16  }
   0x8   : > { %p31_p4 = por %p30_p2, %p29_p1  ;;  %p36_p5 = scmp.eq.s32.totalorder %s1375_s13, 0 }
   0x9   : > { %p80_p6 = scmp.eq.s32.totalorder %s1375_s13, 2  ;;  %p924_p9 = scmp.ge.s32.totalorder %s1304_s12, 3 }
   0xa   : > { %p1392_p7 = por %p36_p5, %p35_p3 }
   0xb   : > { %p1396_p8 = por %p80_p6, %p29_p1  ;;  %105 = sbr.rel (%p924_p9) target bundleno = 52 (0x34), region = 20 }
  0x10   : > { %108 = sbr.rel (!%p31_p4) target bundleno = 52 (0x34), region = 24  ;;  %s109_s20 = sand.u32 (%p31_p4), 1, %s1300_s11  }
  0x11   : > { %s926_s21 = sshll.u32 (%p31_p4), %s1304_s12, 4  ;;  %s925_s22 = sshll.u32 (%p31_p4), %s109_s20, 7 }
  0x12   : > { %s115_s23 = ssub.s32 (%p31_p4), 38, %s926_s21  ;;  %s1406_s27 = scalar_lea.sflag (%p31_p4), [#allocation3], %s109_s20 }
  0x13   : > { %p116_p10 = scmp.lt.s32.totalorder (%p31_p4), %s115_s23, 16  ;;  %s113_s28 = scalar_lea.vmem (%p31_p4), [#allocation2], %s925_s22 }
  0x15   : > { %s1850_s23 = smov (!%p116_p10, %s115_s23), 16 }
  0x16   : > { %s927_s24 = sshll.u32 %s1850_s23, 3 }
  0x17   : > { %s119_s25 = ssub.s32 128, %s927_s24 }
  0x18   : > { %s120_s26 = sshll.u32 %s119_s25, 4 }
  0x19   : > { %121 = vsyncadd %s1406_s27, %s120_s26  ;;  %p1409_p11 = scmp.ne.s32.totalorder %s927_s24, 0  ;;  %s1000_s30 = sshll.u32 %s1304_s12, 7 }
  0x1a   : > { %s124_s5 = scalar_lea.hbm %s1814_s0, %s1000_s30  ;;  %s1417_s6 = sshll.u32 %s113_s28, 4  ;;  %s129_s6 = int_to_ptr.vmem [resolvable:$true] %s1417_s6 }
  0x1b   : > { %s126_s7 = sshll.u32 %s124_s5, 4  ;;  %s931_s8 = sshll.u32 %s1850_s23, 7  ;;  %s1420_s7 = int_to_ptr.hbm [resolvable:$true] %s126_s7 }
  0x1c   : > { %s1199_s9 = sshra.s32 %s1420_s7, 4  ;;  %s1201_s15 = sshrl.u32 %s931_s8, 4  ;;  %s1200_s9 = int_to_ptr.hbm [resolvable:$true] %s1199_s9 }
  0x1d   : > { %s1206_s16 = scalar_lea.hbm %s1200_s9, %s1201_s15  ;;  %s1210_s22 = scalar_lea.hbm %s1814_s0, 304 }
  0x1e   : > { %p1207_p12 = scmp.ne.s32.totalorder %s1200_s9, %s1206_s16  ;;  %p1211_p1 = scmp.lt.s32.totalorder %s1200_s9, %s1814_s0 }
  0x1f   : > { %p1212_p2 = scmp.lt.s32.totalorder %s1210_s22, %s1206_s16 }
  0x20   : > { %p1208_p13 = pnand %p1207_p12, %p1409_p11 }
  0x21   : > { %p1213_p3 = por %p1212_p2, %p1211_p1 }
  0x22   : > { %p1209_p0 = pneg %p1208_p13 }
  0x24   : > { %p1214_p4 = pnand %p1213_p3, %p1209_p0 }
  0x26   : > { %1217 = shalt.err (!%p1214_p4)
}
  0x27   : > { %s1218_s26 = sshra.s32 %s129_s6, 4  ;;  %s1338_s30 = smov [#allocation2]   ;;  %s1219_s26 = int_to_ptr.vmem [resolvable:$true] %s1218_s26 }
  0x28   : > { %s1225_s28 = scalar_lea.vmem %s1219_s26, %s1201_s15  ;;  %s1229_s3 = scalar_lea.vmem %s1338_s30, 256 }
  0x29   : > { %p1226_p5 = scmp.ne.s32.totalorder %s1219_s26, %s1225_s28  ;;  %p1231_p10 = scmp.lt.s32.totalorder %s1229_s3, %s1225_s28 }
  0x2b   : > { %p1227_p6 = pnand %p1226_p5, %p1409_p11 }
  0x2d   : > { %p1228_p9 = pneg %p1227_p6 }
  0x2f   : > { %p1233_p12 = pnand %p1231_p10, %p1228_p9 }
  0x31   : > { %1236 = shalt.err (!%p1233_p12)
}
  0x32   : > { %s1339_s4 = smov 128   ;;  %s1340_s5 = smov 8  }
  0x33   : > { %134 = dma.hbm_to_vmem [thread:$0]  (%p1409_p11), %s1420_s7, %s931_s8, %s129_s6, %s1406_s27, %s1339_s4, %s1339_s4, %s1340_s5  }
  0x34 PF: > { %p932_p13 = scmp.ge.s32.totalorder %s1304_s12, 1  ;;  %p136_p0 = scmp.lt.s32.totalorder %s1304_s12, 4 }
  0x36   : > { %p137_p1 = pnand %p932_p13, %p136_p0 }
  0x37   : > { %s142_s9 = sand.u32 (!%p137_p1), 1, %s1296_s10  }
  0x38   : > { %140 = sbr.rel (%p137_p1) target bundleno = 351 (0x15f), region = 28  ;;  %s1449_s15 = sshll.u32 (!%p137_p1), %s142_s9, 7 }
  0x39   : > { %s143_s16 = scalar_lea.sflag (!%p137_p1), [#allocation3], %s142_s9  ;;  %s1452_s20 = scalar_lea.vmem (!%p137_p1), [#allocation2], %s1449_s15 }
  0x3d   : > { %1287 = dma.done.wait (%p1392_p7), %s143_s16, 2048  }
  0x3e   : > { %1289 = vsyncadd (%p1392_p7), %s143_s16, 4294965248  ;;  %v1008_v0 = vld [vmem:[%s1815_s1 + $0x38] sm:$0xff]  ;;  %v1007_v1 = vld [vmem:[%s1815_s1 + $0x30] sm:$0xff]  ;;  %vm618_vm0 = vcmask 130048   ;;  %s1532_s4 = scalar_lea.vmem [#allocation4], %s1449_s15   ;;  %s984_s5 = sshll.u32 (%p1396_p8), %s1375_s13, 4 }
  0x3f   : > { %265 = vmatpush.bf16.msra.mxu0 %v1008_v0  ;;  %1012 = vmatpush.bf16.msra.mxu1 %v1008_v0  ;;  %v1006_v2 = vld [vmem:[%s1815_s1 + $0x28] sm:$0xff]  ;;  %v1005_v3 = vld [vmem:[%s1815_s1 + $0x20] sm:$0xff]  ;;  %v1004_v4 = vld [vmem:[%s1815_s1 + $0x18] sm:$0xff]  ;;  %s1009_s9 = sshll.u32 (%p1396_p8), %s1375_s13, 7  ;;  %s643_s15 = ssub.s32 (%p1396_p8), 38, %s984_s5 }
  0x40   : > { %1013 = vmatpush.bf16.msra.mxu2 %v1008_v0  ;;  %1014 = vmatpush.bf16.msra.mxu3 %v1008_v0  ;;  %v1003_v5 = vld [vmem:[%s1815_s1 + $0x10] sm:$0xff]  ;;  %v1002_v6 = vld [vmem:[%s1815_s1 + $0x8] sm:$0xff]  ;;  %v1001_v7 = vld [vmem:[%s1815_s1] sm:$0xff]  ;;  %s1714_s23 = scalar_lea.vmem (%p1396_p8), %s1816_s2, %s1009_s9   ;;  %p644_p7 = scmp.lt.s32.totalorder (%p1396_p8), %s643_s15, 16 }
  0x41   : > { %v177_v8 = vld [vmem:[%s1452_s20] sm:$0xff]  ;;  %v178_v9 = vld [vmem:[%s1452_s20 + $0x8] sm:$0xff]  ;;  %v179_v20 = vld [vmem:[%s1452_s20 + $0x10] sm:$0xff] }
  0x42   : > { %v181_v10 = vld [vmem:[%s1452_s20 + $0x20] sm:$0xff]  ;;  %v182_v11 = vld [vmem:[%s1452_s20 + $0x28] sm:$0xff]  ;;  %v193_v16 = vpack.c.bf16 %v178_v9, %v177_v8  ;;  %v180_v21 = vld [vmem:[%s1452_s20 + $0x18] sm:$0xff] }
  0x43   : > { %266 = vmatpush.bf16.msra.mxu0 %v1007_v1  ;;  %1015 = vmatpush.bf16.msra.mxu1 %v1007_v1  ;;  %v185_v12 = vld [vmem:[%s1452_s20 + $0x40] sm:$0xff]  ;;  %v186_v13 = vld [vmem:[%s1452_s20 + $0x48] sm:$0xff]  ;;  %v195_v17 = vpack.c.bf16 %v182_v11, %v181_v10  ;;  %v183_v22 = vld [vmem:[%s1452_s20 + $0x30] sm:$0xff]  ;;  %v194_v28 = vpack.c.bf16 %v180_v21, %v179_v20 }
  0x44   : > { %1016 = vmatpush.bf16.msra.mxu2 %v1007_v1  ;;  %1017 = vmatpush.bf16.msra.mxu3 %v1007_v1  ;;  %v189_v14 = vld [vmem:[%s1452_s20 + $0x60] sm:$0xff]  ;;  %v190_v15 = vld [vmem:[%s1452_s20 + $0x68] sm:$0xff]  ;;  %v197_v18 = vpack.c.bf16 %v186_v13, %v185_v12  ;;  %v184_v23 = vld [vmem:[%s1452_s20 + $0x38] sm:$0xff] }
  0x45   : > { %v199_v19 = vpack.c.bf16 %v190_v15, %v189_v14  ;;  %v187_v24 = vld [vmem:[%s1452_s20 + $0x50] sm:$0xff]  ;;  %v188_v25 = vld [vmem:[%s1452_s20 + $0x58] sm:$0xff]  ;;  %v196_v29 = vpack.c.bf16 %v184_v23, %v183_v22 }
  0x46   : > { %v191_v26 = vld [vmem:[%s1452_s20 + $0x70] sm:$0xff]  ;;  %v192_v27 = vld [vmem:[%s1452_s20 + $0x78] sm:$0xff]  ;;  %v198_v30 = vpack.c.bf16 %v188_v25, %v187_v24 }
  0x47   : > { %267 = vmatpush.bf16.msra.mxu0 %v1006_v2  ;;  %1018 = vmatpush.bf16.msra.mxu1 %v1006_v2  ;;  %v200_v31 = vpack.c.bf16 %v192_v27, %v191_v26 }
  0x48   : > { %1019 = vmatpush.bf16.msra.mxu2 %v1006_v2  ;;  %1020 = vmatpush.bf16.msra.mxu3 %v1006_v2 }
  0x4b   : > { %268 = vmatpush.bf16.msra.mxu0 %v1005_v3  ;;  %1021 = vmatpush.bf16.msra.mxu1 %v1005_v3 }
  0x4c   : > { %1022 = vmatpush.bf16.msra.mxu2 %v1005_v3  ;;  %1023 = vmatpush.bf16.msra.mxu3 %v1005_v3 }
  0x4f   : > { %269 = vmatpush.bf16.msra.mxu0 %v1004_v4  ;;  %1024 = vmatpush.bf16.msra.mxu1 %v1004_v4 }
  0x50   : > { %1025 = vmatpush.bf16.msra.mxu2 %v1004_v4  ;;  %1026 = vmatpush.bf16.msra.mxu3 %v1004_v4 }
  0x53   : > { %270 = vmatpush.bf16.msra.mxu0 %v1003_v5  ;;  %1027 = vmatpush.bf16.msra.mxu1 %v1003_v5 }
  0x54   : > { %1028 = vmatpush.bf16.msra.mxu2 %v1003_v5  ;;  %1029 = vmatpush.bf16.msra.mxu3 %v1003_v5 }
  0x57   : > { %271 = vmatpush.bf16.msra.mxu0 %v1002_v6  ;;  %1030 = vmatpush.bf16.msra.mxu1 %v1002_v6 }
  0x58   : > { %1031 = vmatpush.bf16.msra.mxu2 %v1002_v6  ;;  %1032 = vmatpush.bf16.msra.mxu3 %v1002_v6 }
  0x5b   : > { %272 = vmatpush.bf16.msra.mxu0 %v1001_v7  ;;  %1033 = vmatpush.bf16.msra.mxu1 %v1001_v7 }
  0x5c   : > { %1034 = vmatpush.bf16.msra.mxu2 %v1001_v7  ;;  %1035 = vmatpush.bf16.msra.mxu3 %v1001_v7 }
  0x5e   : > { %273 = vmatmul.bf16.vlgmr.msra.gmra.mxu0 %v193_v16  ;;  %283 = vmatmul.bf16.vlgmr.msra.gmra.mxu1 %v195_v17 }
  0x5f   : > { %293 = vmatmul.bf16.vlgmr.msra.gmra.mxu2 %v197_v18  ;;  %303 = vmatmul.bf16.vlgmr.msra.gmra.mxu3 %v199_v19 }
  0x6e   : > { %278 = vmatmul.bf16.gmra.mxu0 %v194_v28  ;;  %288 = vmatmul.bf16.gmra.mxu1 %v196_v29 }
  0x6f   : > { %298 = vmatmul.bf16.gmra.mxu2 %v198_v30  ;;  %308 = vmatmul.bf16.gmra.mxu3 %v200_v31 }
  0xdb   : > { %v274_v32 = vpop.f32.mrf.mxu0  ;;  %v284_v33 = vpop.f32.mrf.mxu1 }
  0xdc   : > { %v967_v34 = vmul.f32 -1.442695, %v274_v32  ;;  %v971_v35 = vmul.f32 -1.442695, %v284_v33 }
  0xde   : > { %1135 = vpow2.f32 %v967_v34 }
  0xdf   : > { %1137 = vpow2.f32 %v971_v35 }
  0xe2   : > { %v294_v36 = vpop.f32.mrf.mxu2  ;;  %v304_v37 = vpop.f32.mrf.mxu3 }
  0xe3   : > { %v975_v38 = vmul.f32 -1.442695, %v294_v36  ;;  %v979_v39 = vmul.f32 -1.442695, %v304_v37  ;;  %v276_v40 = vpop.f32.mrf.mxu0  ;;  %v286_v41 = vpop.f32.mrf.mxu1 }
  0xe4   : > { %v1136_v42 = vpop.eup %1135  ;;  %v968_v45 = vmul.f32 -1.442695, %v276_v40  ;;  %v972_v47 = vmul.f32 -1.442695, %v286_v41 }
  0xe5   : > { %v1138_v43 = vpop.eup %1137  ;;  %v362_v44 = vadd.f32 1.0, %v1136_v42  ;;  %1139 = vpow2.f32 %v975_v38 }
  0xe6   : > { %v366_v46 = vadd.f32 1.0, %v1138_v43  ;;  %1141 = vpow2.f32 %v979_v39 }
  0xe7   : > { %1143 = vrcp.f32 %v362_v44  ;;  %v387_v55 = vand.u32 2147483647, %v362_v44  ;;  %v389_v56 = vand.u32 2147483648, %v362_v44  ;;  %vm383_vm1 = vweird.f32 %v362_v44 }
  0xe8   : > { %1145 = vrcp.f32 %v366_v46  ;;  %v447_v57 = vand.u32 2147483647, %v366_v46  ;;  %v449_v63 = vand.u32 2147483648, %v366_v46  ;;  %vm443_vm2 = vweird.f32 %v366_v46 }
  0xe9   : > { %1147 = vpow2.f32 %v968_v45  ;;  %vm1504_vm3 = vcmp.eq.f32.partialorder %v387_v55, 8.507059e+37  ;;  %v390_v4 = vor.u32 1.1754944e-38, %v389_v56 }
  0xea   : > { %1149 = vpow2.f32 %v972_v47  ;;  %v296_v48 = vpop.f32.mrf.mxu2  ;;  %v306_v53 = vpop.f32.mrf.mxu3  ;;  %vm1508_vm4 = vcmp.eq.f32.partialorder %v447_v57, 8.507059e+37  ;;  %v450_v13 = vor.u32 1.1754944e-38, %v449_v63 }
  0xeb   : > { %v1140_v49 = vpop.eup %1139  ;;  %v976_v50 = vmul.f32 -1.442695, %v296_v48  ;;  %v980_v0 = vmul.f32 -1.442695, %v306_v53  ;;  %v279_v7 = vpop.f32.mrf.mxu0 }
  0xec   : > { %v1142_v51 = vpop.eup %1141  ;;  %v1498_v52 = vadd.f32 1.0, %v1140_v49  ;;  %v289_v11 = vpop.f32.mrf.mxu1  ;;  %v969_v17 = vmul.f32 -1.442695, %v279_v7 }
  0xed   : > { %v1144_v54 = vpop.eup %1143  ;;  %v1500_v58 = vadd.f32 1.0, %v1142_v51  ;;  %v1521_v21 = vmul.f32 -1.442695, %v289_v11 }
  0xee   : > { %v1146_v59 = vpop.eup %1145  ;;  %v379_v60 = vmul.f32 %v1144_v54, %v362_v44  ;;  %1151 = vrcp.f32 %v1498_v52  ;;  %vm384_vm5 = vweird.f32 %v1144_v54  ;;  %v507_v16 = vand.u32 2147483647, %v1498_v52 }
  0xef   : > { %v1148_v61 = vpop.eup %1147  ;;  %v439_v62 = vmul.f32 %v1146_v59, %v366_v46  ;;  %1153 = vpow2.f32 %v976_v50  ;;  %vm444_vm6 = vweird.f32 %v1146_v59  ;;  %vm385_vm7 = vmor %vm383_vm1, %vm384_vm5  ;;  %vm503_vm8 = vweird.f32 %v1498_v52 }
  0xf0   : > { %v1150_v1 = vpop.eup %1149  ;;  %v380_v2 = vsub.f32 1.0, %v379_v60  ;;  %1155 = vrcp.f32 %v1500_v58  ;;  %v1512_v9 = vadd.f32 1.0, %v1148_v61  ;;  %vm445_vm9 = vmor %vm443_vm2, %vm444_vm6  ;;  %v509_v24 = vand.u32 2147483648, %v1498_v52 }
  0xf1   : > { %v440_v5 = vsub.f32 1.0, %v439_v62  ;;  %v1514_v10 = vadd.f32 1.0, %v1150_v1  ;;  %1157 = vpow2.f32 %v980_v0  ;;  %v567_v25 = vand.u32 2147483647, %v1500_v58 }
  0xf2   : > { %v381_v8 = vmul.f32 %v1144_v54, %v380_v2  ;;  %1159 = vrcp.f32 %v1512_v9  ;;  %vm1538_vm10 = vcmp.eq.f32.partialorder %v507_v16, 8.507059e+37  ;;  %vm563_vm11 = vweird.f32 %v1500_v58  ;;  %v299_v37 = vpop.f32.mrf.mxu2  ;;  %v309_v63 = vpop.f32.mrf.mxu3 }
  0xf3   : > { %v441_v12 = vmul.f32 %v1146_v59, %v440_v5  ;;  %1161 = vrcp.f32 %v1514_v10  ;;  %v569_v32 = vand.u32 2147483648, %v1500_v58  ;;  %v510_v39 = vor.u32 1.1754944e-38, %v509_v24  ;;  %v281_v6 = vpop.f32.mrf.mxu0 }
  0xf4   : > { %v1152_v14 = vpop.eup %1151  ;;  %v382_v15 = vadd.f32 %v1144_v54, %v381_v8  ;;  %vm1548_vm14 = vcmp.eq.f32.partialorder %v567_v25, 8.507059e+37  ;;  %1163 = vpow2.f32 %v969_v17  ;;  %v402_v47 = vand.u32 2147483647, %v1512_v9 }
  0xf5   : > { %v1154_v18 = vpop.eup %1153  ;;  %v442_v19 = vadd.f32 %v1146_v59, %v441_v12  ;;  %v499_v20 = vmul.f32 %v1152_v14, %v1498_v52  ;;  %vm504_vm12 = vweird.f32 %v1152_v14  ;;  %v570_v46 = vor.u32 1.1754944e-38, %v569_v32  ;;  %v291_v12 = vpop.f32.mrf.mxu1 }
  0xf6   : > { %v1156_v22 = vpop.eup %1155  ;;  %v386_v23 = vsel %vm385_vm7, %v1144_v54, %v382_v15  ;;  %v1546_v36 = vadd.f32 1.0, %v1154_v18  ;;  %vm505_vm15 = vmor %vm503_vm8, %vm504_vm12  ;;  %v977_v48 = vmul.f32 -1.442695, %v299_v37  ;;  %v404_v52 = vand.u32 2147483648, %v1512_v9 }
  0xf7   : > { %v391_v26 = vsel %vm1504_vm3, %v390_v4, %v386_v23  ;;  %v446_v27 = vsel %vm445_vm9, %v1146_v59, %v442_v19  ;;  %v500_v28 = vsub.f32 1.0, %v499_v20  ;;  %v559_v29 = vmul.f32 %v1156_v22, %v1500_v58  ;;  %v1158_v33 = vpop.eup %1157 }
  0xf8   : > { %619 = vst.msk [vmem:[%s1532_s4] sm:$0xff] %vm618_vm0, %v391_v26  ;;  %v451_v30 = vsel %vm1508_vm4, %v450_v13, %v446_v27  ;;  %v1160_v38 = vpop.eup %1159  ;;  %vm564_vm13 = vweird.f32 %v1156_v22  ;;  %v1553_v44 = vadd.f32 1.0, %v1158_v33  ;;  %1165 = vrcp.f32 %v1546_v36 }
  0xf9   : > { %623 = vst.msk [vmem:[%s1532_s4 + $0x20] sm:$0xff] %vm618_vm0, %v451_v30  ;;  %v501_v34 = vmul.f32 %v1152_v14, %v500_v28  ;;  %v560_v35 = vsub.f32 1.0, %v559_v29  ;;  %v394_v43 = vmul.f32 %v1160_v38, %v1512_v9  ;;  %v1162_v45 = vpop.eup %1161  ;;  %vm565_vm1 = vmor %vm563_vm11, %vm564_vm13  ;;  %vm399_vm2 = vweird.f32 %v1160_v38 }
  0xfa   : > { %v454_v53 = vmul.f32 %v1162_v45, %v1514_v10  ;;  %v462_v55 = vand.u32 2147483647, %v1514_v10  ;;  %1167 = vrcp.f32 %v1553_v44  ;;  %v1164_v60 = vpop.eup %1163  ;;  %vm398_vm3 = vweird.f32 %v1512_v9  ;;  %v301_v20 = vpop.f32.mrf.mxu2 }
  0xfb   : > { %v502_v41 = vadd.f32 %v1152_v14, %v501_v34  ;;  %v561_v42 = vmul.f32 %v1156_v22, %v560_v35  ;;  %v395_v51 = vsub.f32 1.0, %v394_v43  ;;  %vm1573_vm4 = vcmp.eq.f32.partialorder %v402_v47, 8.507059e+37  ;;  %vm400_vm6 = vmor %vm398_vm3, %vm399_vm2 }
  0xfc   : > { %v455_v59 = vsub.f32 1.0, %v454_v53  ;;  %v464_v62 = vand.u32 2147483648, %v1514_v10  ;;  %vm459_vm5 = vweird.f32 %v1162_v45  ;;  %v1580_v2 = vadd.f32 1.0, %v1164_v60 }
  0xfd   : > { %v506_v49 = vsel %vm505_vm15, %v1152_v14, %v502_v41  ;;  %v562_v50 = vadd.f32 %v1156_v22, %v561_v42  ;;  %v396_v57 = vmul.f32 %v1160_v38, %v395_v51  ;;  %v405_v4 = vor.u32 1.1754944e-38, %v404_v52 }
  0xfe   : > { %v511_v54 = vsel %vm1538_vm10, %v510_v39, %v506_v49  ;;  %v456_v1 = vmul.f32 %v1162_v45, %v455_v59  ;;  %v1166_v3 = vpop.eup %1165  ;;  %vm458_vm7 = vweird.f32 %v1514_v10  ;;  %vm1584_vm8 = vcmp.eq.f32.partialorder %v462_v55, 8.507059e+37 }
  0xff   : > { %627 = vst.msk [vmem:[%s1532_s4 + $0x40] sm:$0xff] %vm618_vm0, %v511_v54  ;;  %v566_v56 = vsel %vm565_vm1, %v1156_v22, %v562_v50  ;;  %v397_v0 = vadd.f32 %v1160_v38, %v396_v57  ;;  %1169 = vpow2.f32 %v1521_v21  ;;  %v514_v9 = vmul.f32 %v1166_v3, %v1546_v36  ;;  %vm460_vm9 = vmor %vm458_vm7, %vm459_vm5 }
 0x100   : > { %v571_v61 = vsel %vm1548_vm14, %v570_v46, %v566_v56  ;;  %v457_v8 = vadd.f32 %v1162_v45, %v456_v1  ;;  %v981_v11 = vmul.f32 -1.442695, %v309_v63  ;;  %v465_v10 = vor.u32 1.1754944e-38, %v464_v62  ;;  %v1168_v15 = vpop.eup %1167 }
 0x101   : > { %631 = vst.msk [vmem:[%s1532_s4 + $0x60] sm:$0xff] %vm618_vm0, %v571_v61  ;;  %v401_v7 = vsel %vm400_vm6, %v1160_v38, %v397_v0  ;;  %v522_v14 = vand.u32 2147483647, %v1546_v36  ;;  %1171 = vrcp.f32 %v1580_v2  ;;  %v515_v17 = vsub.f32 1.0, %v514_v9 }
 0x102   : > { %v406_v13 = vsel %vm1573_vm4, %v405_v4, %v401_v7  ;;  %v461_v16 = vsel %vm460_vm9, %v1162_v45, %v457_v8  ;;  %v524_v18 = vand.u32 2147483648, %v1546_v36  ;;  %v970_v19 = vmul.f32 -1.442695, %v281_v6  ;;  %v311_v45 = vpop.f32.mrf.mxu3 }
 0x103   : > { %620 = vst.msk [vmem:[%s1532_s4 + $0x8] sm:$0xff] %vm618_vm0, %v406_v13  ;;  %v466_v21 = vsel %vm1584_vm8, %v465_v10, %v461_v16  ;;  %v574_v22 = vmul.f32 %v1168_v15, %v1553_v44  ;;  %1173 = vpow2.f32 %v977_v48  ;;  %v974_v23 = vmul.f32 -1.442695, %v291_v12 }
 0x104   : > { %624 = vst.msk [vmem:[%s1532_s4 + $0x28] sm:$0xff] %vm618_vm0, %v466_v21  ;;  %v516_v24 = vmul.f32 %v1166_v3, %v515_v17  ;;  %vm518_vm10 = vweird.f32 %v1546_v36  ;;  %vm519_vm11 = vweird.f32 %v1166_v3  ;;  %1175 = vpow2.f32 %v981_v11 }
 0x105   : > { %v1170_v25 = vpop.eup %1169  ;;  %vm1604_vm12 = vcmp.eq.f32.partialorder %v522_v14, 8.507059e+37  ;;  %v575_v27 = vsub.f32 1.0, %v574_v22  ;;  %v582_v28 = vand.u32 2147483647, %v1553_v44  ;;  %v978_v29 = vmul.f32 -1.442695, %v301_v20  ;;  %vm520_vm13 = vmor %vm518_vm10, %vm519_vm11 }
 0x106   : > { %v517_v30 = vadd.f32 %v1166_v3, %v516_v24  ;;  %v584_v31 = vand.u32 2147483648, %v1553_v44  ;;  %v1610_v32 = vadd.f32 1.0, %v1170_v25  ;;  %1177 = vpow2.f32 %v970_v19 }
 0x107   : > { %v1172_v33 = vpop.eup %1171  ;;  %v525_v34 = vor.u32 1.1754944e-38, %v524_v18  ;;  %v576_v35 = vmul.f32 %v1168_v15, %v575_v27  ;;  %vm579_vm14 = vweird.f32 %v1168_v15  ;;  %1179 = vpow2.f32 %v974_v23 }
 0x108   : > { %v521_v36 = vsel %vm520_vm13, %v1166_v3, %v517_v30  ;;  %vm578_vm15 = vweird.f32 %v1553_v44  ;;  %v409_v37 = vmul.f32 %v1172_v33, %v1580_v2  ;;  %1181 = vrcp.f32 %v1610_v32 }
 0x109   : > { %v1174_v38 = vpop.eup %1173  ;;  %v526_v39 = vsel %vm1604_vm12, %v525_v34, %v521_v36  ;;  %v577_v40 = vadd.f32 %v1168_v15, %v576_v35  ;;  %vm583_vm1 = vcmp.eq.f32.partialorder %v582_v28, 8.507059e+37  ;;  %1183 = vpow2.f32 %v978_v29  ;;  %vm580_vm2 = vmor %vm578_vm15, %vm579_vm14 }
 0x10a   : > { %v1176_v41 = vpop.eup %1175  ;;  %628 = vst.msk [vmem:[%s1532_s4 + $0x48] sm:$0xff] %vm618_vm0, %v526_v39  ;;  %v585_v42 = vor.u32 1.1754944e-38, %v584_v31  ;;  %v410_v43 = vsub.f32 1.0, %v409_v37  ;;  %vm413_vm3 = vweird.f32 %v1580_v2  ;;  %v1620_v44 = vadd.f32 1.0, %v1174_v38 }
 0x10b   : > { %v581_v46 = vsel %vm580_vm2, %v1168_v15, %v577_v40  ;;  %v417_v47 = vand.u32 2147483647, %v1580_v2  ;;  %v419_v48 = vand.u32 2147483648, %v1580_v2  ;;  %v1624_v49 = vadd.f32 1.0, %v1176_v41 }
 0x10c   : > { %v1178_v50 = vpop.eup %1177  ;;  %v586_v51 = vsel %vm583_vm1, %v585_v42, %v581_v46  ;;  %v411_v53 = vmul.f32 %v1172_v33, %v410_v43  ;;  %vm414_vm4 = vweird.f32 %v1172_v33  ;;  %1185 = vrcp.f32 %v1620_v44 }
 0x10d   : > { %v1180_v54 = vpop.eup %1179  ;;  %632 = vst.msk [vmem:[%s1532_s4 + $0x68] sm:$0xff] %vm618_vm0, %v586_v51  ;;  %1187 = vrcp.f32 %v1624_v49  ;;  %v982_v52 = vmul.f32 -1.442695, %v311_v45  ;;  %vm415_vm5 = vmor %vm413_vm3, %vm414_vm4  ;;  %vm418_vm6 = vcmp.eq.f32.partialorder %v417_v47, 8.507059e+37  ;;  %v420_v59 = vor.u32 1.1754944e-38, %v419_v48 }
 0x10e   : > { %v1182_v55 = vpop.eup %1181  ;;  %v412_v56 = vadd.f32 %v1172_v33, %v411_v53  ;;  %v477_v58 = vand.u32 2147483647, %v1610_v32  ;;  %v479_v62 = vand.u32 2147483648, %v1610_v32  ;;  %v1635_v63 = vadd.f32 1.0, %v1178_v50 }
 0x10f   : > { %v1184_v57 = vpop.eup %1183  ;;  %v469_v60 = vmul.f32 %v1182_v55, %v1610_v32  ;;  %v1637_v3 = vadd.f32 1.0, %v1180_v54  ;;  %1189 = vpow2.f32 %v982_v52  ;;  %vm473_vm7 = vweird.f32 %v1610_v32 }
 0x110   : > { %v416_v61 = vsel %vm415_vm5, %v1172_v33, %v412_v56  ;;  %v537_v2 = vand.u32 2147483647, %v1620_v44  ;;  %1191 = vrcp.f32 %v1635_v63  ;;  %v1644_v5 = vadd.f32 1.0, %v1184_v57 }
 0x111   : > { %v421_v0 = vsel %vm418_vm6, %v420_v59, %v416_v61  ;;  %v470_v1 = vsub.f32 1.0, %v469_v60  ;;  %vm474_vm8 = vweird.f32 %v1182_v55  ;;  %1193 = vrcp.f32 %v1637_v3 }
 0x112   : > { %v1186_v4 = vpop.eup %1185  ;;  %621 = vst.msk [vmem:[%s1532_s4 + $0x10] sm:$0xff] %vm618_vm0, %v421_v0  ;;  %vm1648_vm9 = vcmp.eq.f32.partialorder %v477_v58, 8.507059e+37  ;;  %v480_v11 = vor.u32 1.1754944e-38, %v479_v62  ;;  %v539_v12 = vand.u32 2147483648, %v1620_v44  ;;  %v597_v15 = vand.u32 2147483647, %v1624_v49  ;;  %vm475_vm10 = vmor %vm473_vm7, %vm474_vm8 }
 0x113   : > { %v1188_v6 = vpop.eup %1187  ;;  %v471_v7 = vmul.f32 %v1182_v55, %v470_v1  ;;  %v529_v8 = vmul.f32 %v1186_v4, %v1620_v44  ;;  %v599_v16 = vand.u32 2147483648, %v1624_v49  ;;  %vm533_vm11 = vweird.f32 %v1620_v44 }
 0x114   : > { %v589_v13 = vmul.f32 %v1188_v6, %v1624_v49  ;;  %vm593_vm12 = vweird.f32 %v1624_v49  ;;  %1195 = vrcp.f32 %v1644_v5  ;;  %vm534_vm13 = vweird.f32 %v1186_v4 }
 0x115   : > { %v472_v10 = vadd.f32 %v1182_v55, %v471_v7  ;;  %v530_v14 = vsub.f32 1.0, %v529_v8  ;;  %v1190_v18 = vpop.eup %1189  ;;  %vm1661_vm14 = vcmp.eq.f32.partialorder %v537_v2, 8.507059e+37  ;;  %v540_v24 = vor.u32 1.1754944e-38, %v539_v12  ;;  %vm535_vm2 = vmor %vm533_vm11, %vm534_vm13 }
 0x116   : > { %v590_v17 = vsub.f32 1.0, %v589_v13  ;;  %v1192_v22 = vpop.eup %1191  ;;  %vm594_vm15 = vweird.f32 %v1188_v6  ;;  %vm1669_vm1 = vcmp.eq.f32.partialorder %v597_v15, 8.507059e+37  ;;  %v600_v29 = vor.u32 1.1754944e-38, %v599_v16 }
 0x117   : > { %v476_v19 = vsel %vm475_vm10, %v1182_v55, %v472_v10  ;;  %v531_v20 = vmul.f32 %v1186_v4, %v530_v14  ;;  %v1194_v26 = vpop.eup %1193  ;;  %v424_v30 = vmul.f32 %v1192_v22, %v1635_v63  ;;  %vm428_vm3 = vweird.f32 %v1635_v63  ;;  %vm595_vm4 = vmor %vm593_vm12, %vm594_vm15 }
 0x118   : > { %v481_v23 = vsel %vm1648_vm9, %v480_v11, %v476_v19  ;;  %v591_v25 = vmul.f32 %v1188_v6, %v590_v17  ;;  %v432_v32 = vand.u32 2147483647, %v1635_v63  ;;  %v484_v33 = vmul.f32 %v1194_v26, %v1637_v3 }
 0x119   : > { %625 = vst.msk [vmem:[%s1532_s4 + $0x30] sm:$0xff] %vm618_vm0, %v481_v23  ;;  %v532_v27 = vadd.f32 %v1186_v4, %v531_v20  ;;  %v425_v35 = vsub.f32 1.0, %v424_v30  ;;  %v434_v36 = vand.u32 2147483648, %v1635_v63  ;;  %v377_v37 = vadd.f32 1.0, %v1190_v18 }
 0x11a   : > { %v592_v31 = vadd.f32 %v1188_v6, %v591_v25  ;;  %v1196_v38 = vpop.eup %1195  ;;  %v485_v41 = vsub.f32 1.0, %v484_v33  ;;  %v494_v42 = vand.u32 2147483648, %v1637_v3  ;;  %vm429_vm5 = vweird.f32 %v1192_v22 }
 0x11b   : > { %v536_v34 = vsel %vm535_vm2, %v1186_v4, %v532_v27  ;;  %v426_v44 = vmul.f32 %v1192_v22, %v425_v35  ;;  %v544_v45 = vmul.f32 %v1196_v38, %v1644_v5  ;;  %vm489_vm6 = vweird.f32 %v1194_v26  ;;  %vm430_vm8 = vmor %vm428_vm3, %vm429_vm5 }
 0x11c   : > { %v541_v39 = vsel %vm1661_vm14, %v540_v24, %v536_v34  ;;  %v596_v40 = vsel %vm595_vm4, %v1188_v6, %v592_v31  ;;  %v486_v46 = vmul.f32 %v1194_v26, %v485_v41  ;;  %v492_v47 = vand.u32 2147483647, %v1637_v3 }
 0x11d   : > { %629 = vst.msk [vmem:[%s1532_s4 + $0x50] sm:$0xff] %vm618_vm0, %v541_v39  ;;  %v601_v43 = vsel %vm1669_vm1, %v600_v29, %v596_v40  ;;  %1197 = vrcp.f32 %v377_v37  ;;  %v427_v48 = vadd.f32 %v1192_v22, %v426_v44  ;;  %vm433_vm7 = vcmp.eq.f32.partialorder %v432_v32, 8.507059e+37 }
 0x11e   : > { %633 = vst.msk [vmem:[%s1532_s4 + $0x70] sm:$0xff] %vm618_vm0, %v601_v43  ;;  %v435_v49 = vor.u32 1.1754944e-38, %v434_v36  ;;  %v545_v50 = vsub.f32 1.0, %v544_v45  ;;  %v487_v51 = vadd.f32 %v1194_v26, %v486_v46  ;;  %vm488_vm9 = vweird.f32 %v1637_v3 }
 0x11f   : > { %v552_v53 = vand.u32 2147483647, %v1644_v5  ;;  %v554_v54 = vand.u32 2147483648, %v1644_v5  ;;  %v431_v52 = vsel %vm430_vm8, %v1192_v22, %v427_v48  ;;  %vm490_vm10 = vmor %vm488_vm9, %vm489_vm6  ;;  %v495_v55 = vor.u32 1.1754944e-38, %v494_v42 }
 0x120   : > { %v546_v56 = vmul.f32 %v1196_v38, %v545_v50  ;;  %vm549_vm11 = vweird.f32 %v1196_v38  ;;  %v436_v57 = vsel %vm433_vm7, %v435_v49, %v431_v52  ;;  %v491_v59 = vsel %vm490_vm10, %v1194_v26, %v487_v51 }
 0x121   : > { %vm493_vm12 = vcmp.eq.f32.partialorder %v492_v47, 8.507059e+37  ;;  %622 = vst.msk [vmem:[%s1532_s4 + $0x18] sm:$0xff] %vm618_vm0, %v436_v57  ;;  %vm548_vm13 = vweird.f32 %v1644_v5  ;;  %v555_v62 = vor.u32 1.1754944e-38, %v554_v54  ;;  %vm553_vm15 = vcmp.eq.f32.partialorder %v552_v53, 8.507059e+37 }
 0x122   : > { %v496_v60 = vsel %vm493_vm12, %v495_v55, %v491_v59  ;;  %v547_v61 = vadd.f32 %v1196_v38, %v546_v56  ;;  %vm550_vm14 = vmor %vm548_vm13, %vm549_vm11  ;;  %v614_v4 = vand.u32 2147483648, %v377_v37  ;;  %v612_v6 = vand.u32 2147483647, %v377_v37 }
 0x123   : > { %v1198_v58 = vpop.eup %1197  ;;  %626 = vst.msk [vmem:[%s1532_s4 + $0x38] sm:$0xff] %vm618_vm0, %v496_v60  ;;  %vm608_vm2 = vweird.f32 %v377_v37 }
 0x124   : > { %v551_v63 = vsel %vm550_vm14, %v1196_v38, %v547_v61  ;;  %v604_v0 = vmul.f32 %v1198_v58, %v377_v37  ;;  %vm609_vm1 = vweird.f32 %v1198_v58  ;;  %v615_v5 = vor.u32 1.1754944e-38, %v614_v4 }
 0x125   : > { %v556_v1 = vsel %vm553_vm15, %v555_v62, %v551_v63  ;;  %vm610_vm3 = vmor %vm608_vm2, %vm609_vm1  ;;  %vm613_vm4 = vcmp.eq.f32.partialorder %v612_v6, 8.507059e+37 }
 0x126   : > { %630 = vst.msk [vmem:[%s1532_s4 + $0x58] sm:$0xff] %vm618_vm0, %v556_v1  ;;  %v605_v3 = vsub.f32 1.0, %v604_v0 }
 0x128   : > { %v606_v2 = vmul.f32 %v1198_v58, %v605_v3 }
 0x12a   : > { %v607_v7 = vadd.f32 %v1198_v58, %v606_v2  ;;  %641 = sbr.rel (!%p1396_p8) target bundleno = 351 (0x15f), region = 36 }
 0x12c   : > { %v611_v8 = vsel %vm610_vm3, %v1198_v58, %v607_v7 }
 0x12d   : > { %v616_v9 = vsel %vm613_vm4, %v615_v5, %v611_v8 }
 0x12e   : > { %634 = vst.msk [vmem:[%s1532_s4 + $0x78] sm:$0xff] %vm618_vm0, %v616_v9 }
 0x12f   : > { %s1852_s15 = smov (!%p644_p7, %s643_s15), 16 }
 0x130   : > { %s985_s27 = sshll.u32 %s1852_s15, 3 }
 0x131   : > { %p988_p11 = scmp.eq.s32.totalorder %s985_s27, 0 }
 0x132   : > { %s1720_s19 = sshrl.u32 (!%p988_p11), %s1852_s15, 4 }
 0x133   : > { %652 = sbr.rel (%p988_p11) target bundleno = 351 (0x15f), region = 40  ;;  %p989_p8 = scmp.le.s32.totalorder (!%p988_p11), %s1720_s19, 0 }
 0x138   : > { %875 = sbr.rel (%p989_p8) target bundleno = 334 (0x14e), region = 122  ;;  %s1840_s13 = smov (!%p989_p8), %s1714_s23 }
 0x139   : > { %s1841_s12 = smov (!%p989_p8), %s1532_s4  ;;  %s1729_s29 = smov (!%p989_p8), 0  }
 0x13a   : > { %s1731_s6 = smov (!%p989_p8), 0  }
 0x13d LB: >> { %v745_v11 = vld [vmem:[%s1312_s12] sm:$0xff]  ;;  %v747_v12 = vld [vmem:[%s1312_s12 + $0x8] sm:$0xff]  ;;  %v749_v13 = vld [vmem:[%s1312_s12 + $0x10] sm:$0xff]  ;;  %s777_s7 = sadd.s32 1, %s1316_s29  ;;  %s739_s6 = sadd.s32 1, %s1320_s6   ;;  %s1320_s6 = sphi %s1731_s6, %s739_s6   ;;  %s1316_s29 = sphi %s1729_s29, %s1844_s29   ;;  %s1312_s12 = sphi %s1841_s12, %s1843_s12   ;;  %s1308_s13 = sphi %s1840_s13, %s1842_s13  }
 0x13e   : >> { %746 = vst [vmem:[%s1308_s13] sm:$0xff] %v745_v11  ;;  %v751_v10 = vld [vmem:[%s1312_s12 + $0x18] sm:$0xff]  ;;  %p778_p2 = scmp.ge.s32.totalorder %s777_s7, %s1720_s19  ;;  %v753_v14 = vld [vmem:[%s1312_s12 + $0x20] sm:$0xff]  ;;  %v755_v15 = vld [vmem:[%s1312_s12 + $0x28] sm:$0xff]  ;;  %p738_p3 = scmp.ge.s32.totalorder %s739_s6, %s1720_s19 }
 0x13f   : >> { %748 = vst [vmem:[%s1308_s13 + $0x8] sm:$0xff] %v747_v12  ;;  %v757_v16 = vld [vmem:[%s1312_s12 + $0x30] sm:$0xff]  ;;  %v759_v17 = vld [vmem:[%s1312_s12 + $0x38] sm:$0xff]  ;;  %v761_v18 = vld [vmem:[%s1312_s12 + $0x40] sm:$0xff] }
 0x140   : >> { %750 = vst [vmem:[%s1308_s13 + $0x10] sm:$0xff] %v749_v13  ;;  %s1854_s7 = smov (%p778_p2, %s777_s7), 0  ;;  %v763_v19 = vld [vmem:[%s1312_s12 + $0x48] sm:$0xff]  ;;  %v765_v20 = vld [vmem:[%s1312_s12 + $0x50] sm:$0xff]  ;;  %v767_v21 = vld [vmem:[%s1312_s12 + $0x58] sm:$0xff] }
 0x141   : >> { %752 = vst [vmem:[%s1308_s13 + $0x18] sm:$0xff] %v751_v10  ;;  %s990_s18 = sshll.u32 %s1854_s7, 7  ;;  %v769_v22 = vld [vmem:[%s1312_s12 + $0x60] sm:$0xff]  ;;  %v771_v23 = vld [vmem:[%s1312_s12 + $0x68] sm:$0xff]  ;;  %v773_v24 = vld [vmem:[%s1312_s12 + $0x70] sm:$0xff]  ;;  %s1844_s29 = smov %s1854_s7 }
 0x142   : >> { %754 = vst [vmem:[%s1308_s13 + $0x20] sm:$0xff] %v753_v14  ;;  %s782_s8 = scalar_lea.vmem %s1532_s4, %s990_s18 [#allocation4]   ;;  %s783_s21 = scalar_lea.vmem %s1714_s23, %s990_s18   ;;  %v775_v25 = vld [vmem:[%s1312_s12 + $0x78] sm:$0xff] }
 0x143   : >> { %756 = vst [vmem:[%s1308_s13 + $0x28] sm:$0xff] %v755_v15  ;;  %s1843_s12 = smov %s782_s8 }
 0x144   : >> { %758 = vst [vmem:[%s1308_s13 + $0x30] sm:$0xff] %v757_v16 }
 0x145   : >> { %760 = vst [vmem:[%s1308_s13 + $0x38] sm:$0xff] %v759_v17 }
 0x146   : >> { %762 = vst [vmem:[%s1308_s13 + $0x40] sm:$0xff] %v761_v18 }
 0x147   : >> { %764 = vst [vmem:[%s1308_s13 + $0x48] sm:$0xff] %v763_v19 }
 0x148   : >> { %766 = vst [vmem:[%s1308_s13 + $0x50] sm:$0xff] %v765_v20 }
 0x149   : >> { %768 = vst [vmem:[%s1308_s13 + $0x58] sm:$0xff] %v767_v21  ;;  %741 = sbr.rel (!%p738_p3) target bundleno = 317 (0x13d), region = 128 }
 0x14a   : >> { %770 = vst [vmem:[%s1308_s13 + $0x60] sm:$0xff] %v769_v22 }
 0x14b   : >> { %772 = vst [vmem:[%s1308_s13 + $0x68] sm:$0xff] %v771_v23 }
 0x14c   : >> { %774 = vst [vmem:[%s1308_s13 + $0x70] sm:$0xff] %v773_v24 }
 0x14d   : >> { %776 = vst [vmem:[%s1308_s13 + $0x78] sm:$0xff] %v775_v25  ;;  %s1842_s13 = smov %s783_s21 }
 0x14e PF: > { %s1793_s22 = sand.u32 15, %s1852_s15   ;;  %s1010_s24 = sshll.u32 %s1720_s19, 7 }
 0x14f   : > { %s788_s25 = scalar_lea.vmem %s1532_s4, %s1010_s24 [#allocation4]   ;;  %s790_s26 = scalar_lea.vmem %s1714_s23, %s1010_s24  }
 0x150   : > { %p995_p4 = scmp.le.s32.totalorder %s1793_s22, 0 }
 0x151   : > { %s1322_s28 = smov (!%p995_p4), %s790_s26   ;;  %s1326_s30 = smov (!%p995_p4), %s788_s25  }
 0x152   : > { %889 = sbr.rel (%p995_p4) target bundleno = 351 (0x15f), region = 133  ;;  %s1330_s3 = smov (!%p995_p4), 0  }
 0x153   : > { %s1334_s5 = smov (!%p995_p4), 0  }
 0x157 LB: >> { %v800_v26 = vld [vmem:[%s1328_s30] sm:$0xff]  ;;  %s802_s9 = sadd.s32 1, %s1332_s3  ;;  %s794_s5 = sadd.s32 1, %s1336_s5   ;;  %s1336_s5 = sphi %s1334_s5, %s794_s5   ;;  %s1332_s3 = sphi %s1330_s3, %s1331_s3   ;;  %s1328_s30 = sphi %s1326_s30, %s807_s30   ;;  %s1324_s28 = sphi %s1322_s28, %s808_s28  }
 0x158   : >> { %801 = vst [vmem:[%s1324_s28] sm:$0xff] %v800_v26  ;;  %p803_p5 = scmp.ge.s32.totalorder %s802_s9, %s1793_s22  ;;  %p793_p6 = scmp.ge.s32.totalorder %s794_s5, %s1793_s22 }
 0x15a   : >> { %s1856_s9 = smov (%p803_p5, %s802_s9), 0  ;;  %796 = sbr.rel (!%p793_p6) target bundleno = 343 (0x157), region = 139 }
 0x15b   : >> { %s996_s4 = sshll.u32 %s1856_s9, 3  ;;  %s1331_s3 = smov %s1856_s9  }
 0x15c   : >> { %s807_s30 = scalar_lea.vmem %s788_s25, %s996_s4 [#allocation4]   ;;  %s808_s28 = scalar_lea.vmem %s790_s26, %s996_s4  }
 0x15f PF: > { %p12_p9 = scmp.ge.s32.totalorder %s1378_s14, 5   ;;  %s1845_s9 = smov %s1296_s10 }
 0x160   : > { %s1846_s10 = smov %s1300_s11  ;;  %s1847_s11 = smov %s1388_s17 }
 0x161   : > { %s1848_s12 = smov %s1378_s14  ;;  %14 = sbr.rel (!%p12_p9) target bundleno = 3 (0x3), region = 150 }
 0x166   :  { %824 = vsyncpa [#allocation3], 1 }
 0x167   :  { %826 = vsyncpa [#allocation3 + $0x1], 1 }

</bundles_post_ra>
